<compile_context>
chip_gen: v7x
topology: tpu7x:2x2x1
jax: 0.10.0
libtpu: 0.0.40
codegen_flags: <defaults>
</compile_context>

<pallas_src>
import jax
import jax.numpy as jnp
from jax.experimental import pallas as pl
from jax.experimental.pallas import tpu as pltpu


def _copy_kernel(x_ref, o_ref):
    # Identity copy of one (TILE_B, TILE_F) slab of the flattened tensor.
    o_ref[...] = x_ref[...]


def _choose_tiles(B, F, itemsize, block_budget_bytes, min_steps=8):
    """Pick lane-dense (tile_b, tile_f) blocks.

    Invariants:
      * tile_b * tile_f * itemsize <= block_budget_bytes (never overshoots).
      * tile_f == F (full extent) or a multiple of 128 lanes.
      * tile_b == B (full extent) or a multiple of the sublane packing.
      * when the batch is large enough, the grid keeps >= min_steps blocks so
        prefetch/writeback overlap and v7x can shard across both TCs.
    """
    sub = {4: 8, 2: 16, 1: 32}.get(itemsize, 8)  # sublane packing multiple
    row_bytes = F * itemsize

    if sub * row_bytes <= block_budget_bytes:
        # Full-width rows: last dim == F (full extent, exempt from the
        # 128-multiple rule); grid only over rows -> wide unmasked stores.
        tile_f = F
        if B <= sub:
            return B, tile_f                       # tiny batch: one slab
        rows_in_budget = (block_budget_bytes // row_bytes) // sub * sub
        target = max(sub, (pl.cdiv(B, min_steps) // sub) * sub)
        tile_b = max(sub, min(rows_in_budget, target))
        return tile_b, tile_f

    # Rows too large for full width within budget: tile the feature axis in
    # big multiples of 128 lanes, preferring an even divisor of F so the last
    # j-block is never a ragged (masked) partial store.
    tile_b = B if B < sub else sub
    max_f = (block_budget_bytes // (tile_b * itemsize)) // 128 * 128
    max_f = max(128, min(max_f, F))
    tile_f = max_f
    for cand in range(max_f, 127, -128):
        if F % cand == 0:
            tile_f = cand
            break
    return tile_b, tile_f


def linear_net_forward(x):
    """LinearNet.forward production path: x.view(B, -1).

    A contiguous NCHW flatten is a pure metadata change; XLA lowers it to a
    bitcast, so no kernel (and no HBM traffic) is generated here.
    """
    return jnp.reshape(x, (x.shape[0], -1))


def linear_net_forward_pallas(x):
    """Materialized-copy variant of x.view(B, -1) as a Pallas TPU kernel.

    Only needed when an explicit fresh (B, F) buffer is required; otherwise
    prefer `linear_net_forward` (free).  Purely HBM-bandwidth bound.
    """
    B = x.shape[0]
    F = 1
    for d in x.shape[1:]:
        F *= d

    # Glue: the view/reshape itself (zero-compute, metadata-only).
    x_flat = jnp.reshape(x, (B, F))

    itemsize = jnp.dtype(x.dtype).itemsize

    # Per-generation VMEM sizing.  ~4 MiB blocks already sit at ~85%+ of the
    # HBM roofline; only 128 MiB-VMEM parts (v5e/v6e) get larger blocks.
    try:
        vmem_cap = int(getattr(pltpu.get_tpu_info(), "vmem_capacity_bytes",
                               64 << 20))
    except Exception:
        vmem_cap = 64 << 20
    if vmem_cap >= (128 << 20):          # v5e / v6e (128 MiB VMEM)
        block_budget = 8 << 20
        vmem_limit = 64 << 20
    else:                                # v7x (64 MiB VMEM per TC)
        block_budget = 4 << 20
        vmem_limit = 32 << 20

    tile_b, tile_f = _choose_tiles(B, F, itemsize, block_budget)
    grid = (pl.cdiv(B, tile_b), pl.cdiv(F, tile_f))

    out = pl.pallas_call(
        _copy_kernel,
        out_shape=jax.ShapeDtypeStruct((B, F), x.dtype),
        grid_spec=pltpu.PrefetchScalarGridSpec(
            num_scalar_prefetch=0,
            grid=grid,
            in_specs=[pl.BlockSpec((tile_b, tile_f), lambda i, j: (i, j))],
            out_specs=pl.BlockSpec((tile_b, tile_f), lambda i, j: (i, j)),
        ),
        compiler_params=pltpu.CompilerParams(
            dimension_semantics=("parallel", "parallel"),
            vmem_limit_bytes=vmem_limit,
        ),
        cost_estimate=pl.CostEstimate(
            flops=0,
            transcendentals=0,
            bytes_accessed=2 * B * F * itemsize,
        ),
    )(x_flat)
    return out


if __name__ == "__main__":
    # LinearNet.__init__ defines no parameters, so nothing to initialize.
    key = jax.random.PRNGKey(0)
    B, C, H, W = 2, 4, 16, 16
    x = jax.random.normal(key, (B, C, H, W), dtype=jnp.float32)

    # Exercise the Pallas kernel (materialized-copy path) once.
    y = linear_net_forward_pallas(x)
    y = jax.block_until_ready(y)

    # Correctness check against the free (metadata-only) forward.
    y_ref = linear_net_forward(x)
    assert y.shape == (B, C * H * W), y.shape
    assert jnp.array_equal(y, y_ref), "flatten mismatch"

    print("KERNEL_OK")
</pallas_src>

<mosaic_0001>
module attributes {stable_mosaic.version = 11 : i64} {
  func.func @_copy_kernel(%arg0: i32, %arg1: i32, %arg2: memref<2x1024xf32, #tpu.memory_space<vmem>>, %arg3: memref<2x1024xf32, #tpu.memory_space<vmem>>) attributes {dimension_semantics = [#tpu.dimension_semantics<parallel>, #tpu.dimension_semantics<parallel>], iteration_bounds = array<i64: 1, 1>, scalar_prefetch = 0 : i64, scratch_operands = 0 : i64, tpu.core_type = #tpu.core_type<tc>, window_params = [{transform_indices = @transform_0, window_bounds = array<i64: 2, 1024>}, {transform_indices = @transform_1, window_bounds = array<i64: 2, 1024>}]} {
    %c0 = arith.constant 0 : index
    %c0_0 = arith.constant 0 : index
    %0 = vector.load %arg2[%c0, %c0_0] : memref<2x1024xf32, #tpu.memory_space<vmem>>, vector<2x1024xf32>
    %c0_1 = arith.constant 0 : index
    %c0_2 = arith.constant 0 : index
    %1 = vector.load %arg3[%c0_1, %c0_2] : memref<2x1024xf32, #tpu.memory_space<vmem>>, vector<2x1024xf32>
    tpu.vector_store %arg3[%c0_1, %c0_2], %0 {strides = array<i32>} : memref<2x1024xf32, #tpu.memory_space<vmem>>, vector<2x1024xf32>,
    return
  }
  func.func @transform_0(%arg0: i32, %arg1: i32) -> (i32, i32) {
    %c0_i32 = arith.constant 0 : i32
    return %arg0, %arg1 : i32, i32
  }
  func.func @transform_1(%arg0: i32, %arg1: i32) -> (i32, i32) {
    %c0_i32 = arith.constant 0 : i32
    return %arg0, %arg1 : i32, i32
  }
}

</mosaic_0001>

<bundles_post_ra>
// kernel: tpu_custom_call.1
= control target key start
LH: loop header
LB: loop body
LE: loop exit
PB: predicated region body
PF: predicated region fallthrough
CT: control target
= control target key end

     0   :  { %6 = vsyncpa [#allocation3], 0  ;;  %s126_s0 = inlined_call_operand.hbm [shape: f32[2,1024], index: 0, kind: input, shape index: {}]   ;;  %s127_s1 = inlined_call_operand.hbm [shape: f32[2,1024], index: 1, kind: output, shape index: {}]  }
   0x1   :  { %7 = vsyncpa [#allocation4], 0  ;;  %s90_s6 = smov [#allocation2]   ;;  %s42_s10 = scalar_lea.hbm %s126_s0, 256 }
   0x2   :  { %s14_s7 = sshll.u32 %s90_s6, 4  ;;  %p43_p0 = scmp.ne.s32.totalorder %s126_s0, %s42_s10  ;;  %s15_s7 = int_to_ptr.vmem [resolvable:$true] %s14_s7 }
   0x3   :  { %p46_p1 = scmp.lt.u32.totalorder %s42_s10, %s126_s0 }
   0x5   :  { %p48_p2 = pnand %p46_p1, %p43_p0 }
   0x7   :  { %51 = shalt.err (!%p48_p2)
}
   0x8   :  { %s52_s15 = scalar_lea.vmem %s15_s7, 256  ;;  %p57_p4 = scmp.lt.s32.totalorder %s15_s7, %s15_s7 }
   0x9   :  { %p53_p3 = scmp.ne.s32.totalorder %s15_s7, %s52_s15  ;;  %p58_p5 = scmp.lt.s32.totalorder %s52_s15, %s52_s15 }
   0xb   :  { %p59_p6 = por %p58_p5, %p57_p4 }
   0xd   :  { %p60_p7 = pnand %p59_p6, %p53_p3 }
   0xf   :  { %63 = shalt.err (!%p60_p7)
}
  0x10   :  { %17 = dma.hbm_to_vmem [thread:$0]  %s126_s0, 256, %s15_s7, [#allocation3]  }
  0x11   :  { %86 = dma.done.wait [#allocation3], 256  }
  0x12   :  { %87 = vsyncadd [#allocation3], 4294967040  ;;  %s91_s18 = smov [#allocation5]   ;;  %v21_v0 = vld [vmem:[#allocation2] sm:$0xff]  ;;  %v22_v1 = vld [vmem:[#allocation2 + $0x8] sm:$0xff] }
  0x13   :  { %s31_s19 = sshll.u32 %s91_s18, 4  ;;  %23 = vst [vmem:[#allocation5] sm:$0xff] %v21_v0  ;;  %24 = vst [vmem:[#allocation5 + $0x8] sm:$0xff] %v22_v1  ;;  %s32_s19 = int_to_ptr.vmem [resolvable:$true] %s31_s19 }
  0x14   :  { %s64_s20 = scalar_lea.vmem %s32_s19, 256  ;;  %p69_p9 = scmp.lt.s32.totalorder %s32_s19, %s32_s19 }
  0x15   :  { %p65_p8 = scmp.ne.s32.totalorder %s32_s19, %s64_s20  ;;  %p70_p10 = scmp.lt.s32.totalorder %s64_s20, %s64_s20 }
  0x17   :  { %p71_p11 = por %p70_p10, %p69_p9 }
  0x19   :  { %p72_p12 = pnand %p71_p11, %p65_p8 }
  0x1b   :  { %75 = shalt.err (!%p72_p12)
}
  0x1c   :  { %s76_s0 = scalar_lea.hbm %s127_s1, 256 }
  0x1d   :  { %p77_p13 = scmp.ne.s32.totalorder %s127_s1, %s76_s0  ;;  %p80_p0 = scmp.lt.u32.totalorder %s76_s0, %s127_s1 }
  0x1f   :  { %p82_p1 = pnand %p80_p0, %p77_p13 }
  0x21   :  { %85 = shalt.err (!%p82_p1)
}
  0x22   :  { %34 = dma.vmem_to_hbm [thread:$0]  %s32_s19, 256, %s127_s1, [#allocation4]  }
  0x23   :  { %88 = dma.done.wait [#allocation4], 256  }
  0x24   :  { %89 = vsyncadd [#allocation4], 4294967040 }
  0x25   :  { %38 = vsyncpa [#allocation3], 1 }
  0x26   :  { %39 = vsyncpa [#allocation4], 1 }

</bundles_post_ra>
